<compile_context>
chip_gen: v7x
topology: tpu7x:2x2x1
jax: 0.10.0
libtpu: 0.0.40
codegen_flags: <defaults>
</compile_context>

<pallas_src>
import functools

import jax
import jax.numpy as jnp
from jax.experimental import pallas as pl
from jax.experimental.pallas import tpu as pltpu


def _round_up(x, m):
    return ((x + m - 1) // m) * m


def _latent_sample_kernel(x_ref, w_ref, b_ref, eps_ref, out_ref, *, n_pad):
    # x: (TM, in_dim), w: (in_dim, 2*n_pad), b: (1, 2*n_pad), eps: (TM, n_pad)
    x = x_ref[...]

    # Single fused matmul for both heads (MXU, f32 accumulation), then bias add.
    y = jnp.dot(x, w_ref[...], preferred_element_type=jnp.float32) + b_ref[...]

    mu = y[:, :n_pad]              # z_mu  (static, 128-aligned slice)
    p = y[:, n_pad:]               # z_p

    sigma = jnp.logaddexp(p, 0.0)  # numerically-stable softplus (EUP path)
    sample = mu + sigma * eps_ref[...]

    # Lane-dense, 128-aligned slab stores: [sample | mu | p]
    out_ref[:, 0:n_pad] = sample
    out_ref[:, n_pad:2 * n_pad] = mu
    out_ref[:, 2 * n_pad:3 * n_pad] = p


def latent_sample(x, w_mu, b_mu, w_p, b_p, eps, *, tm_max=256):
    """x: (B, in_dim); w_*: (in_dim, out_dim); b_*: (out_dim,); eps: (B, out_dim).
    Returns (sample, z_mu, z_p), each (B, out_dim) float32."""
    B, in_dim = x.shape
    out_dim = w_mu.shape[1]

    n_pad = _round_up(out_dim, 128)               # lane-dense output width
    tm = tm_max if B > tm_max else _round_up(B, 8)  # batch tile (sublane-aligned)
    b_pad = _round_up(B, tm)
    grid = (pl.cdiv(b_pad, tm),)

    # Fuse + pad parameters: W_fused = [W_mu_pad | W_p_pad], b_fused likewise.
    pad_cols = n_pad - out_dim
    w_fused = jnp.concatenate(
        [jnp.pad(w_mu, ((0, 0), (0, pad_cols))),
         jnp.pad(w_p, ((0, 0), (0, pad_cols)))], axis=1).astype(jnp.float32)
    b_fused = jnp.concatenate(
        [jnp.pad(b_mu, (0, pad_cols)),
         jnp.pad(b_p, (0, pad_cols))]).reshape(1, 2 * n_pad).astype(jnp.float32)

    x_p = jnp.pad(x.astype(jnp.float32), ((0, b_pad - B), (0, 0)))
    eps_p = jnp.pad(eps.astype(jnp.float32), ((0, b_pad - B), (0, pad_cols)))

    # Rough double-buffered VMEM budget; clamp so it stays safe on v7x (64 MiB physical).
    f32 = 4
    vmem_need = 2 * f32 * (tm * in_dim            # x tile
                           + in_dim * 2 * n_pad   # fused weight
                           + 2 * n_pad            # fused bias
                           + tm * n_pad           # eps tile
                           + tm * 3 * n_pad)      # output slab tile
    vmem_limit = int(min(max(2 * vmem_need, 16 * 1024 * 1024), 48 * 1024 * 1024))

    kernel = functools.partial(_latent_sample_kernel, n_pad=n_pad)

    slab = pl.pallas_call(
        kernel,
        out_shape=jax.ShapeDtypeStruct((b_pad, 3 * n_pad), jnp.float32),
        grid=grid,
        in_specs=[
            pl.BlockSpec((tm, in_dim), lambda i: (i, 0)),          # x tile
            pl.BlockSpec((in_dim, 2 * n_pad), lambda i: (0, 0)),   # fused W (resident)
            pl.BlockSpec((1, 2 * n_pad), lambda i: (0, 0)),        # fused bias
            pl.BlockSpec((tm, n_pad), lambda i: (i, 0)),           # eps tile
        ],
        out_specs=pl.BlockSpec((tm, 3 * n_pad), lambda i: (i, 0)),
        compiler_params=pltpu.CompilerParams(
            dimension_semantics=("parallel",),   # shards batch tiles across v7x's 2 TCs
            vmem_limit_bytes=vmem_limit,
        ),
    )(x_p, w_fused, b_fused, eps_p)

    sample = slab[:B, 0:out_dim]
    z_mu = slab[:B, n_pad:n_pad + out_dim]
    z_p = slab[:B, 2 * n_pad:2 * n_pad + out_dim]
    return sample, z_mu, z_p


if __name__ == "__main__":
    B, in_dim, out_dim = 8, 32, 32

    key = jax.random.PRNGKey(0)
    kx, kwmu, kbmu, kwp, kbp, keps = jax.random.split(key, 6)

    x = jax.random.normal(kx, (B, in_dim), dtype=jnp.float32)
    # Deterministic parameter init (mimics nn.Linear's uniform(-1/sqrt(in), 1/sqrt(in)))
    bound = 1.0 / jnp.sqrt(jnp.float32(in_dim))
    w_mu = jax.random.uniform(kwmu, (in_dim, out_dim), jnp.float32, -bound, bound)
    b_mu = jax.random.uniform(kbmu, (out_dim,), jnp.float32, -bound, bound)
    w_p = jax.random.uniform(kwp, (in_dim, out_dim), jnp.float32, -bound, bound)
    b_p = jax.random.uniform(kbp, (out_dim,), jnp.float32, -bound, bound)
    # eps ~ N(0,1) generated outside the kernel (torch.randn_like equivalent, reproducible)
    eps = jax.random.normal(keps, (B, out_dim), dtype=jnp.float32)

    sample, z_mu, z_p = latent_sample(x, w_mu, b_mu, w_p, b_p, eps)
    jax.block_until_ready((sample, z_mu, z_p))

    # Pure-JAX reference check
    ref_mu = x @ w_mu + b_mu
    ref_p = x @ w_p + b_p
    ref_sample = ref_mu + jax.nn.softplus(ref_p) * eps
    assert jnp.allclose(z_mu, ref_mu, atol=1e-5)
    assert jnp.allclose(z_p, ref_p, atol=1e-5)
    assert jnp.allclose(sample, ref_sample, atol=1e-5)

    print("KERNEL_OK")
</pallas_src>

<mosaic_0001>
module attributes {stable_mosaic.version = 11 : i64} {
  func.func @_latent_sample_kernel(%arg0: i32, %arg1: memref<8x32xf32, #tpu.memory_space<vmem>>, %arg2: memref<32x256xf32, #tpu.memory_space<vmem>>, %arg3: memref<1x256xf32, #tpu.memory_space<vmem>>, %arg4: memref<8x128xf32, #tpu.memory_space<vmem>>, %arg5: memref<8x384xf32, #tpu.memory_space<vmem>>) attributes {dimension_semantics = [#tpu.dimension_semantics<parallel>], iteration_bounds = array<i64: 1>, scalar_prefetch = 0 : i64, scratch_operands = 0 : i64, tpu.core_type = #tpu.core_type<tc>, window_params = [{transform_indices = @transform_0, window_bounds = array<i64: 8, 32>}, {pipeline_mode = #tpu.pipeline_mode<synchronous>, transform_indices = @transform_1, window_bounds = array<i64: 32, 256>}, {pipeline_mode = #tpu.pipeline_mode<synchronous>, transform_indices = @transform_2, window_bounds = array<i64: 1, 256>}, {transform_indices = @transform_3, window_bounds = array<i64: 8, 128>}, {transform_indices = @transform_4, window_bounds = array<i64: 8, 384>}]} {
    %c0 = arith.constant 0 : index
    %c0_0 = arith.constant 0 : index
    %0 = vector.load %arg1[%c0, %c0_0] : memref<8x32xf32, #tpu.memory_space<vmem>>, vector<8x32xf32>
    %c0_1 = arith.constant 0 : index
    %c0_2 = arith.constant 0 : index
    %1 = vector.load %arg2[%c0_1, %c0_2] : memref<32x256xf32, #tpu.memory_space<vmem>>, vector<32x256xf32>
    %cst = arith.constant dense<0.000000e+00> : vector<8x256xf32>
    %2 = tpu.matmul %0, %1, %cst {dimension_numbers = #tpu.dot_dimension_numbers<[1], [0], [0], [1], [0, 0, 1, 1], [], []>} : vector<8x32xf32>, vector<32x256xf32>, vector<8x256xf32> -> vector<8x256xf32>
    %c0_3 = arith.constant 0 : index
    %c0_4 = arith.constant 0 : index
    %3 = vector.load %arg3[%c0_3, %c0_4] : memref<1x256xf32, #tpu.memory_space<vmem>>, vector<1x256xf32>
    %4 = vector.broadcast %3 : vector<1x256xf32> to vector<8x256xf32>
    %5 = arith.addf %2, %4 : vector<8x256xf32>
    %6 = vector.extract_strided_slice %5 {offsets = [0, 0], sizes = [8, 128], strides = [1, 1]} : vector<8x256xf32> to vector<8x128xf32>
    %7 = vector.extract_strided_slice %5 {offsets = [0, 128], sizes = [8, 128], strides = [1, 1]} : vector<8x256xf32> to vector<8x128xf32>
    %cst_5 = arith.constant 0.000000e+00 : f32
    %8 = vector.broadcast %cst_5 : f32 to vector<8x128xf32>
    %9 = arith.maximumf %7, %8 : vector<8x128xf32>
    %10 = vector.broadcast %cst_5 : f32 to vector<8x128xf32>
    %11 = arith.subf %7, %10 : vector<8x128xf32>
    %12 = arith.cmpf one, %11, %11 : vector<8x128xf32>
    %13 = vector.broadcast %cst_5 : f32 to vector<8x128xf32>
    %14 = arith.addf %7, %13 : vector<8x128xf32>
    %15 = math.absf %11 : vector<8x128xf32>
    %cst_6 = arith.constant 0.000000e+00 : f32
    %16 = vector.broadcast %cst_6 : f32 to vector<8x128xf32>
    %17 = arith.subf %16, %15 : vector<8x128xf32>
    %18 = math.exp %17 : vector<8x128xf32>
    %19 = math.log1p %18 : vector<8x128xf32>
    %20 = arith.addf %9, %19 : vector<8x128xf32>
    %21 = arith.select %12, %14, %20 : vector<8x128xi1>, vector<8x128xf32>
    %c0_7 = arith.constant 0 : index
    %c0_8 = arith.constant 0 : index
    %22 = vector.load %arg4[%c0_7, %c0_8] : memref<8x128xf32, #tpu.memory_space<vmem>>, vector<8x128xf32>
    %23 = arith.mulf %21, %22 : vector<8x128xf32>
    %24 = arith.addf %6, %23 : vector<8x128xf32>
    %c0_9 = arith.constant 0 : index
    %c0_10 = arith.constant 0 : index
    %25 = vector.load %arg5[%c0_9, %c0_10] : memref<8x384xf32, #tpu.memory_space<vmem>>, vector<8x128xf32>
    tpu.vector_store %arg5[%c0_9, %c0_10], %24 {strides = array<i32>} : memref<8x384xf32, #tpu.memory_space<vmem>>, vector<8x128xf32>,
    %c0_11 = arith.constant 0 : index
    %c128 = arith.constant 128 : index
    %26 = vector.load %arg5[%c0_11, %c128] : memref<8x384xf32, #tpu.memory_space<vmem>>, vector<8x128xf32>
    tpu.vector_store %arg5[%c0_11, %c128], %6 {strides = array<i32>} : memref<8x384xf32, #tpu.memory_space<vmem>>, vector<8x128xf32>,
    %c0_12 = arith.constant 0 : index
    %c256 = arith.constant 256 : index
    %27 = vector.load %arg5[%c0_12, %c256] : memref<8x384xf32, #tpu.memory_space<vmem>>, vector<8x128xf32>
    tpu.vector_store %arg5[%c0_12, %c256], %7 {strides = array<i32>} : memref<8x384xf32, #tpu.memory_space<vmem>>, vector<8x128xf32>,
    return
  }
  func.func @transform_0(%arg0: i32) -> (i32, i32) {
    %c0_i32 = arith.constant 0 : i32
    %c0_i32_0 = arith.constant 0 : i32
    return %arg0, %c0_i32 : i32, i32
  }
  func.func @transform_1(%arg0: i32) -> (i32, i32) {
    %c0_i32 = arith.constant 0 : i32
    %c0_i32_0 = arith.constant 0 : i32
    %c0_i32_1 = arith.constant 0 : i32
    return %c0_i32, %c0_i32_0 : i32, i32
  }
  func.func @transform_2(%arg0: i32) -> (i32, i32) {
    %c0_i32 = arith.constant 0 : i32
    %c0_i32_0 = arith.constant 0 : i32
    %c0_i32_1 = arith.constant 0 : i32
    return %c0_i32, %c0_i32_0 : i32, i32
  }
  func.func @transform_3(%arg0: i32) -> (i32, i32) {
    %c0_i32 = arith.constant 0 : i32
    %c0_i32_0 = arith.constant 0 : i32
    return %arg0, %c0_i32 : i32, i32
  }
  func.func @transform_4(%arg0: i32) -> (i32, i32) {
    %c0_i32 = arith.constant 0 : i32
    %c0_i32_0 = arith.constant 0 : i32
    return %arg0, %c0_i32 : i32, i32
  }
}

</mosaic_0001>

<bundles_post_ra>
// kernel: tpu_custom_call.1
= control target key start
LH: loop header
LB: loop body
LE: loop exit
PB: predicated region body
PF: predicated region fallthrough
CT: control target
= control target key end

     0   :  { %9 = vsyncpa [#allocation3], 0  ;;  %s351_s0 = inlined_call_operand.hbm [shape: f32[8,32], index: 0, kind: input, shape index: {}]   ;;  %s352_s1 = inlined_call_operand.hbm [shape: f32[32,256], index: 1, kind: input, shape index: {}]   ;;  %s353_s2 = inlined_call_operand.vmem [shape: f32[1,256], index: 2, kind: input, shape index: {}]   ;;  %s354_s3 = inlined_call_operand.vmem [shape: f32[8,128], index: 3, kind: input, shape index: {}]   ;;  %s355_s4 = inlined_call_operand.hbm [shape: f32[8,384], index: 4, kind: output, shape index: {}]  }
   0x1   :  { %10 = vsyncpa [#allocation6], 0 }
   0x2   :  { %11 = vsyncpa [#allocation4], 0  ;;  %s271_s15 = smov [#allocation2]   ;;  %s272_s17 = smov [#allocation5]  }
   0x3   :  { %s18_s16 = sshll.u32 %s271_s15, 4  ;;  %s27_s18 = sshll.u32 %s272_s17, 4  ;;  %s19_s16 = int_to_ptr.vmem [resolvable:$true] %s18_s16  ;;  %s302_s18 = int_to_ptr.vmem [resolvable:$true] %s27_s18 }
   0x4   :  { %s199_s21 = scalar_lea.hbm %s351_s0, 128 }
   0x5   :  { %p200_p0 = scmp.ne.s32.totalorder %s351_s0, %s199_s21  ;;  %p203_p1 = scmp.lt.u32.totalorder %s199_s21, %s351_s0 }
   0x7   :  { %p205_p2 = pnand %p203_p1, %p200_p0 }
   0x9   :  { %208 = shalt.err (!%p205_p2)
}
   0xa   :  { %s209_s26 = scalar_lea.vmem %s19_s16, 128  ;;  %p214_p4 = scmp.lt.s32.totalorder %s19_s16, %s19_s16 }
   0xb   :  { %p210_p3 = scmp.ne.s32.totalorder %s19_s16, %s209_s26  ;;  %p215_p5 = scmp.lt.s32.totalorder %s209_s26, %s209_s26 }
   0xd   :  { %p216_p6 = por %p215_p5, %p214_p4 }
   0xf   :  { %p217_p7 = pnand %p216_p6, %p210_p3 }
  0x11   :  { %220 = shalt.err (!%p217_p7)
}
  0x12   :  { %21 = dma.hbm_to_vmem [thread:$0]  %s351_s0, 128, %s19_s16, [#allocation3]  }
  0x13   :  { %s221_s5 = scalar_lea.hbm %s352_s1, 1024 }
  0x14   :  { %p222_p8 = scmp.ne.s32.totalorder %s352_s1, %s221_s5  ;;  %p225_p9 = scmp.lt.u32.totalorder %s221_s5, %s352_s1 }
  0x16   :  { %p227_p10 = pnand %p225_p9, %p222_p8 }
  0x18   :  { %230 = shalt.err (!%p227_p10)
}
  0x19   :  { %s231_s10 = scalar_lea.vmem %s302_s18, 1024  ;;  %p236_p12 = scmp.lt.s32.totalorder %s302_s18, %s302_s18 }
  0x1a   :  { %p232_p11 = scmp.ne.s32.totalorder %s302_s18, %s231_s10  ;;  %p237_p13 = scmp.lt.s32.totalorder %s231_s10, %s231_s10 }
  0x1c   :  { %p238_p0 = por %p237_p13, %p236_p12 }
  0x1e   :  { %p239_p1 = pnand %p238_p0, %p232_p11 }
  0x20   :  { %242 = shalt.err (!%p239_p1)
}
  0x21   :  { %s273_s0 = smov 256   ;;  %s274_s11 = smov 16  }
  0x22   :  { %33 = dma.hbm_to_vmem [thread:$0]  %s352_s1, 1024, %s302_s18, [#allocation6], %s273_s0, %s273_s0, %s274_s11  }
  0x23   :  { %265 = dma.done.wait [#allocation3], 128  }
  0x24   :  { %266 = vsyncadd [#allocation3], 4294967168 }
  0x25   :  { %267 = dma.done.wait [#allocation6], 1024  }
  0x26   :  { %268 = vsyncadd [#allocation6], 4294966272  ;;  %v275_v0 = vmov 0.0   ;;  %v46_v1 = vld [vmem:[#allocation5 + $0x8] sm:$0xff]  ;;  %v48_v2 = vld [vmem:[#allocation5 + $0x18] sm:$0xff]  ;;  %vm65_vm0 = vcmask 261120   ;;  %v55_v14 = vlaneseq }
  0x27   :  { %133 = vmatprep.mubr.f32.mxu0 %v275_v0  ;;  %v45_v3 = vld [vmem:[#allocation5] sm:$0xff]  ;;  %v181_v4 = vpack.c.bf16 %v48_v2, %v46_v1  ;;  %v47_v5 = vld [vmem:[#allocation5 + $0x10] sm:$0xff]  ;;  %v50_v6 = vld [vmem:[#allocation5 + $0x28] sm:$0xff]  ;;  %s276_s16 = smov [#allocation7]  }
  0x28   :  { %v52_v7 = vld [vmem:[#allocation5 + $0x38] sm:$0xff]  ;;  %v183_v8 = vpack.c.bf16 %v47_v5, %v45_v3  ;;  %v49_v10 = vld [vmem:[#allocation5 + $0x20] sm:$0xff]  ;;  %v51_v11 = vld [vmem:[#allocation5 + $0x30] sm:$0xff]  ;;  %v56_v15 = vshrl.u32 %v55_v14, 7  ;;  %s170_s17 = sshll.u32 %s276_s16, 4  ;;  %s171_s17 = int_to_ptr.vmem [resolvable:$true] %s170_s17 }
  0x29   :  { %v185_v9 = vpack.c.bf16 %v52_v7, %v50_v6  ;;  %182 = vmatprep.subr.bf16.mxu0 %v181_v4  ;;  %v187_v12 = vpack.c.bf16 %v51_v11, %v49_v10  ;;  %v44_v13 = vld [vmem:[#allocation2] sm:$0xff]  ;;  %s243_s18 = scalar_lea.vmem %s171_s17, 384  ;;  %p248_p3 = scmp.lt.s32.totalorder %s171_s17, %s171_s17 }
  0x2a   :  { %184 = vmatpush1.bf16.msra.mxu0 %v183_v8  ;;  %v57_v16 = vsub.s32 0, %v56_v15  ;;  %v53_v17 = vld [vmem:[%s353_s2] sm:$0x3]  ;;  %v61_v18 = vsub.s32 1, %v56_v15  ;;  %p244_p2 = scmp.ne.s32.totalorder %s171_s17, %s243_s18  ;;  %p249_p4 = scmp.lt.s32.totalorder %s243_s18, %s243_s18 }
  0x2b   :  { %186 = vmatprep.subr.bf16.mxu0 %v185_v9  ;;  %v158_v39 = vld [vmem:[%s354_s3] sm:$0xff] }
  0x2c   :  { %v58_v19 = vrot.slane %v53_v17, %v57_v16  ;;  %v62_v20 = vrot.slane %v53_v17, %v61_v18  ;;  %p250_p5 = por %p249_p4, %p248_p3 }
  0x2e   :  { %188 = vmatpush1.bf16.msra.mxu0 %v187_v12  ;;  %p251_p6 = pnand %p250_p5, %p244_p2 }
  0x31   :  { %180 = vmatmul.mubr.msk.f32.vlgmr.msra.gmra.mrb[0].mxu0 %vm65_vm0, %v44_v13 }
 0x104   :  { %v135_v21 = vpop.f32.mrb[0].mxu0 }
 0x105   :  { %v136_v22 = vadd.f32 %v135_v21, %v58_v19  ;;  %v137_v23 = vpop.f32.mrb[1].mxu0 }
 0x106   :  { %v138_v24 = vadd.f32 %v137_v23, %v62_v20 }
 0x107   :  { %162 = vst [vmem:[#allocation7 + $0x8] sm:$0xff] %v136_v22 }
 0x108   :  { %v143_v25 = vand.u32 2147483647, %v138_v24  ;;  %163 = vst [vmem:[#allocation7 + $0x10] sm:$0xff] %v138_v24  ;;  %v140_v36 = vmax.f32 %v138_v24, 0.0  ;;  %vm141_vm2 = vcmp.ne.f32.partialorder %v138_v24, %v138_v24 }
 0x10a   :  { %v144_v26 = vsub.f32 0.0, %v143_v25 }
 0x10c   :  { %v145_v27 = vmul.f32 1.442695, %v144_v26 }
 0x10e   :  { %195 = vpow2.f32 %v145_v27 }
 0x118   :  { %v196_v28 = vpop.eup %195 }
 0x119   :  { %v147_v29 = vadd.f32 1.0, %v196_v28  ;;  %v150_v30 = vmul.f32 -0.5, %v196_v28  ;;  %v153_v32 = vand.u32 2147483647, %v196_v28 }
 0x11b   :  { %197 = vlog2.f32 %v147_v29  ;;  %v151_v31 = vadd.f32 1.0, %v150_v30  ;;  %vm154_vm1 = vcmp.lt.f32.partialorder %v153_v32, 0.0004427343 }
 0x11d   :  { %v152_v35 = vmul.f32 %v196_v28, %v151_v31 }
 0x125   :  { %v198_v33 = vpop.eup %197 }
 0x126   :  { %v149_v34 = vmul.f32 0.6931472, %v198_v33 }
 0x128   :  { %v155_v37 = vsel %vm154_vm1, %v152_v35, %v149_v34 }
 0x129   :  { %v156_v38 = vadd.f32 %v155_v37, %v140_v36 }
 0x12b   :  { %v157_v40 = vsel %vm141_vm2, %v138_v24, %v156_v38 }
 0x12c   :  { %v159_v41 = vmul.f32 %v158_v39, %v157_v40 }
 0x12e   :  { %v160_v42 = vadd.f32 %v159_v41, %v136_v22 }
 0x130   :  { %161 = vst [vmem:[#allocation7] sm:$0xff] %v160_v42 }
 0x131   :  { %254 = shalt.err (!%p251_p6)
}
 0x132   :  { %s255_s21 = scalar_lea.hbm %s355_s4, 384 }
 0x133   :  { %p256_p7 = scmp.ne.s32.totalorder %s355_s4, %s255_s21  ;;  %p259_p8 = scmp.lt.u32.totalorder %s255_s21, %s355_s4 }
 0x135   :  { %p261_p9 = pnand %p259_p8, %p256_p7 }
 0x137   :  { %264 = shalt.err (!%p261_p9)
}
 0x138   :  { %173 = dma.vmem_to_hbm [thread:$0]  %s171_s17, 384, %s355_s4, [#allocation4]  }
 0x139   :  { %269 = dma.done.wait [#allocation4], 384  }
 0x13a   :  { %270 = vsyncadd [#allocation4], 4294966912 }
 0x13b   :  { %177 = vsyncpa [#allocation3], 1 }
 0x13c   :  { %178 = vsyncpa [#allocation6], 1 }
 0x13d   :  { %179 = vsyncpa [#allocation4], 1 }

</bundles_post_ra>
